<compile_context>
chip_gen: v7x
topology: tpu7x:2x2x1
jax: 0.10.0
libtpu: 0.0.40
codegen_flags: <defaults>
</compile_context>

<pallas_src>
import numpy as np
import jax
import jax.numpy as jnp
from jax.experimental import pallas as pl
from jax.experimental.pallas import tpu as pltpu

INPUT_SIZE = 16
HIDDEN_SIZE = 32
OUTPUT_SIZE = 2        # implied by the fixed 2x2 covariance in forward()
BATCH = 16             # multiple of 8 -> sublane-aligned activations

# --- covariance constants, folded to Python scalars (compile-time literals) --
_SIGMA = np.array([[0.2, 0.1], [0.1, 0.2]], dtype=np.float64)
_Lnp = np.linalg.cholesky(_SIGMA)          # lower Cholesky factor
_SINVnp = np.linalg.inv(_SIGMA)
_L00 = float(_Lnp[0, 0])
_L10 = float(_Lnp[1, 0])
_L11 = float(_Lnp[1, 1])
_SINV00 = float(_SINVnp[0, 0])
_SINV01 = float(_SINVnp[0, 1])
_SINV11 = float(_SINVnp[1, 1])
# -0.5 * (d*log(2*pi) + log|Sigma|), precomputed in Python
_LOGP_CONST = float(-0.5 * (OUTPUT_SIZE * np.log(2.0 * np.pi)
                            + np.log(np.linalg.det(_SIGMA))))


def policy2_kernel(x_ref, w1_ref, b1_ref, w2_ref, b2_ref, w3_ref, b3_ref,
                   w4_ref, b4_ref, z_ref, actions_ref, logp_ref):
    # --- MLP hot path: 4 matmuls + ReLU + tanh (MXU/VPU/EUP) -----------------
    x = x_ref[...]
    h = jnp.maximum(
        jnp.dot(x, w1_ref[...], preferred_element_type=jnp.float32) + b1_ref[...], 0.0)
    h = jnp.maximum(
        jnp.dot(h, w2_ref[...], preferred_element_type=jnp.float32) + b2_ref[...], 0.0)
    h = jnp.maximum(
        jnp.dot(h, w3_ref[...], preferred_element_type=jnp.float32) + b3_ref[...], 0.0)
    mean = jnp.tanh(
        jnp.dot(h, w4_ref[...], preferred_element_type=jnp.float32) + b4_ref[...]) * 0.5

    # --- MultivariateNormal(mean, Sigma): sample + log_prob, fully scalar ----
    # Reparameterized sample: actions = mean + L @ z, z ~ N(0, I).
    # The 2x2 lower-triangular Cholesky is scalarized onto the VPU (no MXU
    # round-trip, no captured constants).
    z = z_ref[...]
    z0 = z[:, 0:1]
    z1 = z[:, 1:2]
    n0 = _L00 * z0
    n1 = _L10 * z0 + _L11 * z1
    actions = mean + jnp.concatenate([n0, n1], axis=-1)
    actions_ref[...] = actions

    # log_prob(actions): diff^T Sigma^-1 diff as a scalar quadratic form,
    # evaluated on the stored sample (same path torch takes).
    diff = actions - mean
    d0 = diff[:, 0:1]
    d1 = diff[:, 1:2]
    maha = (_SINV00 * (d0 * d0)
            + (2.0 * _SINV01) * (d0 * d1)
            + _SINV11 * (d1 * d1))
    logp_ref[...] = _LOGP_CONST - 0.5 * maha


def policy2_forward(x, params, z):
    """Single-invocation fused forward: whole batch + all weights in VMEM."""
    w1, b1, w2, b2, w3, b3, w4, b4 = params
    b = x.shape[0]
    vmem = pl.BlockSpec(memory_space=pltpu.MemorySpace.VMEM)

    actions, logp = pl.pallas_call(
        policy2_kernel,
        out_shape=(
            jax.ShapeDtypeStruct((b, OUTPUT_SIZE), jnp.float32),
            jax.ShapeDtypeStruct((b, 1), jnp.float32),
        ),
        # No grid: the whole problem fits comfortably in VMEM, so one step,
        # one DMA per operand, no pipeline bookkeeping.
        in_specs=[vmem] * 10,
        out_specs=(vmem, vmem),
    )(x, w1, b1, w2, b2, w3, b3, w4, b4, z)
    return actions, logp[:, 0]


def init_params(key):
    """Deterministic Linear params: W stored as [in, out], b as [1, out]."""
    dims = [(INPUT_SIZE, HIDDEN_SIZE), (HIDDEN_SIZE, 128), (128, 32),
            (32, OUTPUT_SIZE)]
    params = []
    for (fan_in, fan_out) in dims:
        key, kw, kb = jax.random.split(key, 3)
        bound = 1.0 / np.sqrt(fan_in)   # matches torch.nn.Linear default scale
        w = jax.random.uniform(kw, (fan_in, fan_out), jnp.float32, -bound, bound)
        bias = jax.random.uniform(kb, (1, fan_out), jnp.float32, -bound, bound)
        params.extend([w, bias])
    return tuple(params)


if __name__ == "__main__":
    key = jax.random.PRNGKey(0)
    k_params, k_x, k_z = jax.random.split(key, 3)

    params = init_params(k_params)
    x = jax.random.normal(k_x, (BATCH, INPUT_SIZE), jnp.float32)
    # standard-normal noise for the reparameterized MultivariateNormal sample
    z = jax.random.normal(k_z, (BATCH, OUTPUT_SIZE), jnp.float32)

    actions, log_probs = policy2_forward(x, params, z)
    jax.block_until_ready((actions, log_probs))

    assert actions.shape == (BATCH, OUTPUT_SIZE)
    assert log_probs.shape == (BATCH,)
    assert bool(jnp.all(jnp.isfinite(actions))) and bool(jnp.all(jnp.isfinite(log_probs)))
    # actions should stay within mean (<=0.5 in abs) plus a few std-devs of noise
    assert bool(jnp.all(jnp.abs(actions) < 0.5 + 6.0 * np.sqrt(0.2)))

    # cross-check the in-kernel MVN math against a pure-JAX reference
    w1, b1, w2, b2, w3, b3, w4, b4 = params
    h = jnp.maximum(x @ w1 + b1, 0.0)
    h = jnp.maximum(h @ w2 + b2, 0.0)
    h = jnp.maximum(h @ w3 + b3, 0.0)
    mean_ref = jnp.tanh(h @ w4 + b4) * 0.5
    L = jnp.asarray(_Lnp, jnp.float32)
    act_ref = mean_ref + z @ L.T
    diff = act_ref - mean_ref
    sinv = jnp.asarray(_SINVnp, jnp.float32)
    logp_ref = _LOGP_CONST - 0.5 * jnp.einsum('bi,ij,bj->b', diff, sinv, diff)
    np.testing.assert_allclose(np.asarray(actions), np.asarray(act_ref),
                               rtol=1e-5, atol=1e-5)
    np.testing.assert_allclose(np.asarray(log_probs), np.asarray(logp_ref),
                               rtol=1e-5, atol=1e-5)
    print("KERNEL_OK")
</pallas_src>

<mosaic_0001>
module attributes {stable_mosaic.version = 11 : i64} {
  func.func @policy2_kernel(%arg0: memref<16x16xf32, #tpu.memory_space<vmem>>, %arg1: memref<16x32xf32, #tpu.memory_space<vmem>>, %arg2: memref<1x32xf32, #tpu.memory_space<vmem>>, %arg3: memref<32x128xf32, #tpu.memory_space<vmem>>, %arg4: memref<1x128xf32, #tpu.memory_space<vmem>>, %arg5: memref<128x32xf32, #tpu.memory_space<vmem>>, %arg6: memref<1x32xf32, #tpu.memory_space<vmem>>, %arg7: memref<32x2xf32, #tpu.memory_space<vmem>>, %arg8: memref<1x2xf32, #tpu.memory_space<vmem>>, %arg9: memref<16x2xf32, #tpu.memory_space<vmem>>, %arg10: memref<16x2xf32, #tpu.memory_space<vmem>>, %arg11: memref<16x1xf32, #tpu.memory_space<vmem>>) attributes {dimension_semantics = [], scalar_prefetch = 0 : i64, scratch_operands = 0 : i64, tpu.core_type = #tpu.core_type<tc>} {
    %c0 = arith.constant 0 : index
    %c0_0 = arith.constant 0 : index
    %0 = vector.load %arg0[%c0, %c0_0] : memref<16x16xf32, #tpu.memory_space<vmem>>, vector<16x16xf32>
    %c0_1 = arith.constant 0 : index
    %c0_2 = arith.constant 0 : index
    %1 = vector.load %arg1[%c0_1, %c0_2] : memref<16x32xf32, #tpu.memory_space<vmem>>, vector<16x32xf32>
    %cst = arith.constant dense<0.000000e+00> : vector<16x32xf32>
    %2 = tpu.matmul %0, %1, %cst {dimension_numbers = #tpu.dot_dimension_numbers<[1], [0], [0], [1], [0, 0, 1, 1], [], []>} : vector<16x16xf32>, vector<16x32xf32>, vector<16x32xf32> -> vector<16x32xf32>
    %c0_3 = arith.constant 0 : index
    %c0_4 = arith.constant 0 : index
    %3 = vector.load %arg2[%c0_3, %c0_4] : memref<1x32xf32, #tpu.memory_space<vmem>>, vector<1x32xf32>
    %4 = vector.broadcast %3 : vector<1x32xf32> to vector<16x32xf32>
    %5 = arith.addf %2, %4 : vector<16x32xf32>
    %cst_5 = arith.constant 0.000000e+00 : f32
    %6 = vector.broadcast %cst_5 : f32 to vector<16x32xf32>
    %7 = arith.maximumf %5, %6 : vector<16x32xf32>
    %c0_6 = arith.constant 0 : index
    %c0_7 = arith.constant 0 : index
    %8 = vector.load %arg3[%c0_6, %c0_7] : memref<32x128xf32, #tpu.memory_space<vmem>>, vector<32x128xf32>
    %cst_8 = arith.constant dense<0.000000e+00> : vector<16x128xf32>
    %9 = tpu.matmul %7, %8, %cst_8 {dimension_numbers = #tpu.dot_dimension_numbers<[1], [0], [0], [1], [0, 0, 1, 1], [], []>} : vector<16x32xf32>, vector<32x128xf32>, vector<16x128xf32> -> vector<16x128xf32>
    %c0_9 = arith.constant 0 : index
    %c0_10 = arith.constant 0 : index
    %10 = vector.load %arg4[%c0_9, %c0_10] : memref<1x128xf32, #tpu.memory_space<vmem>>, vector<1x128xf32>
    %11 = vector.broadcast %10 : vector<1x128xf32> to vector<16x128xf32>
    %12 = arith.addf %9, %11 : vector<16x128xf32>
    %cst_11 = arith.constant 0.000000e+00 : f32
    %13 = vector.broadcast %cst_11 : f32 to vector<16x128xf32>
    %14 = arith.maximumf %12, %13 : vector<16x128xf32>
    %c0_12 = arith.constant 0 : index
    %c0_13 = arith.constant 0 : index
    %15 = vector.load %arg5[%c0_12, %c0_13] : memref<128x32xf32, #tpu.memory_space<vmem>>, vector<128x32xf32>
    %cst_14 = arith.constant dense<0.000000e+00> : vector<16x32xf32>
    %16 = tpu.matmul %14, %15, %cst_14 {dimension_numbers = #tpu.dot_dimension_numbers<[1], [0], [0], [1], [0, 0, 1, 1], [], []>} : vector<16x128xf32>, vector<128x32xf32>, vector<16x32xf32> -> vector<16x32xf32>
    %c0_15 = arith.constant 0 : index
    %c0_16 = arith.constant 0 : index
    %17 = vector.load %arg6[%c0_15, %c0_16] : memref<1x32xf32, #tpu.memory_space<vmem>>, vector<1x32xf32>
    %18 = vector.broadcast %17 : vector<1x32xf32> to vector<16x32xf32>
    %19 = arith.addf %16, %18 : vector<16x32xf32>
    %cst_17 = arith.constant 0.000000e+00 : f32
    %20 = vector.broadcast %cst_17 : f32 to vector<16x32xf32>
    %21 = arith.maximumf %19, %20 : vector<16x32xf32>
    %c0_18 = arith.constant 0 : index
    %c0_19 = arith.constant 0 : index
    %22 = vector.load %arg7[%c0_18, %c0_19] : memref<32x2xf32, #tpu.memory_space<vmem>>, vector<32x2xf32>
    %cst_20 = arith.constant dense<0.000000e+00> : vector<16x2xf32>
    %23 = tpu.matmul %21, %22, %cst_20 {dimension_numbers = #tpu.dot_dimension_numbers<[1], [0], [0], [1], [0, 0, 1, 1], [], []>} : vector<16x32xf32>, vector<32x2xf32>, vector<16x2xf32> -> vector<16x2xf32>
    %c0_21 = arith.constant 0 : index
    %c0_22 = arith.constant 0 : index
    %24 = vector.load %arg8[%c0_21, %c0_22] : memref<1x2xf32, #tpu.memory_space<vmem>>, vector<1x2xf32>
    %25 = vector.broadcast %24 : vector<1x2xf32> to vector<16x2xf32>
    %26 = arith.addf %23, %25 : vector<16x2xf32>
    %27 = math.tanh %26 : vector<16x2xf32>
    %cst_23 = arith.constant 5.000000e-01 : f32
    %28 = vector.broadcast %cst_23 : f32 to vector<16x2xf32>
    %29 = arith.mulf %27, %28 : vector<16x2xf32>
    %c0_24 = arith.constant 0 : index
    %c0_25 = arith.constant 0 : index
    %30 = vector.load %arg9[%c0_24, %c0_25] : memref<16x2xf32, #tpu.memory_space<vmem>>, vector<16x2xf32>
    %31 = vector.extract_strided_slice %30 {offsets = [0, 0], sizes = [16, 1], strides = [1, 1]} : vector<16x2xf32> to vector<16x1xf32>
    %32 = vector.extract_strided_slice %30 {offsets = [0, 1], sizes = [16, 1], strides = [1, 1]} : vector<16x2xf32> to vector<16x1xf32>
    %cst_26 = arith.constant 0.44721359 : f32
    %33 = vector.broadcast %cst_26 : f32 to vector<16x1xf32>
    %34 = arith.mulf %33, %31 : vector<16x1xf32>
    %cst_27 = arith.constant 0.223606795 : f32
    %35 = vector.broadcast %cst_27 : f32 to vector<16x1xf32>
    %36 = arith.mulf %35, %31 : vector<16x1xf32>
    %cst_28 = arith.constant 0.387298346 : f32
    %37 = vector.broadcast %cst_28 : f32 to vector<16x1xf32>
    %38 = arith.mulf %37, %32 : vector<16x1xf32>
    %39 = arith.addf %36, %38 : vector<16x1xf32>
    %40 = tpu.concatenate %34, %39 in 1 : vector<16x1xf32>, vector<16x1xf32> -> vector<16x2xf32>
    %41 = arith.addf %29, %40 : vector<16x2xf32>
    %c0_29 = arith.constant 0 : index
    %c0_30 = arith.constant 0 : index
    %42 = vector.load %arg10[%c0_29, %c0_30] : memref<16x2xf32, #tpu.memory_space<vmem>>, vector<16x2xf32>
    tpu.vector_store %arg10[%c0_29, %c0_30], %41 {strides = array<i32>} : memref<16x2xf32, #tpu.memory_space<vmem>>, vector<16x2xf32>,
    %43 = arith.subf %41, %29 : vector<16x2xf32>
    %44 = vector.extract_strided_slice %43 {offsets = [0, 0], sizes = [16, 1], strides = [1, 1]} : vector<16x2xf32> to vector<16x1xf32>
    %45 = vector.extract_strided_slice %43 {offsets = [0, 1], sizes = [16, 1], strides = [1, 1]} : vector<16x2xf32> to vector<16x1xf32>
    %46 = arith.mulf %44, %44 : vector<16x1xf32>
    %cst_31 = arith.constant 6.66666651 : f32
    %47 = vector.broadcast %cst_31 : f32 to vector<16x1xf32>
    %48 = arith.mulf %47, %46 : vector<16x1xf32>
    %49 = arith.mulf %44, %45 : vector<16x1xf32>
    %cst_32 = arith.constant -6.66666651 : f32
    %50 = vector.broadcast %cst_32 : f32 to vector<16x1xf32>
    %51 = arith.mulf %50, %49 : vector<16x1xf32>
    %52 = arith.addf %48, %51 : vector<16x1xf32>
    %53 = arith.mulf %45, %45 : vector<16x1xf32>
    %cst_33 = arith.constant 6.66666651 : f32
    %54 = vector.broadcast %cst_33 : f32 to vector<16x1xf32>
    %55 = arith.mulf %54, %53 : vector<16x1xf32>
    %56 = arith.addf %52, %55 : vector<16x1xf32>
    %cst_34 = arith.constant 5.000000e-01 : f32
    %57 = vector.broadcast %cst_34 : f32 to vector<16x1xf32>
    %58 = arith.mulf %57, %56 : vector<16x1xf32>
    %cst_35 = arith.constant -0.0845981165 : f32
    %59 = vector.broadcast %cst_35 : f32 to vector<16x1xf32>
    %60 = arith.subf %59, %58 : vector<16x1xf32>
    %c0_36 = arith.constant 0 : index
    %c0_37 = arith.constant 0 : index
    %61 = vector.load %arg11[%c0_36, %c0_37] : memref<16x1xf32, #tpu.memory_space<vmem>>, vector<16x1xf32>
    tpu.vector_store %arg11[%c0_36, %c0_37], %60 {strides = array<i32>} : memref<16x1xf32, #tpu.memory_space<vmem>>, vector<16x1xf32>,
    return
  }
}

</mosaic_0001>

<bundles_post_ra>
// kernel: tpu_custom_call.1
= control target key start
LH: loop header
LB: loop body
LE: loop exit
PB: predicated region body
PF: predicated region fallthrough
CT: control target
= control target key end

     0   :  { %vm48_vm0 = vcmask 130048   ;;  %vm143_vm1 = vcmask 261120   ;;  %s667_s28 = smov 127   ;;  %vm449_vm2 = vcmask 7168   ;;  %vm454_vm3 = vcmask 15360   ;;  %s857_s1 = inlined_call_operand.vmem [shape: f32[16,32], index: 1, kind: input, shape index: {}]   ;;  %s858_s0 = inlined_call_operand.vmem [shape: f32[16,16], index: 0, kind: input, shape index: {}]   ;;  %s859_s3 = inlined_call_operand.vmem [shape: f32[32,128], index: 3, kind: input, shape index: {}]   ;;  %s860_s5 = inlined_call_operand.vmem [shape: f32[128,32], index: 5, kind: input, shape index: {}]   ;;  %s861_s2 = inlined_call_operand.vmem [shape: f32[1,32], index: 2, kind: input, shape index: {}]   ;;  %s862_s9 = inlined_call_operand.vmem [shape: f32[16,2], index: 9, kind: input, shape index: {}]   ;;  %s863_s7 = inlined_call_operand.vmem [shape: f32[32,2], index: 7, kind: input, shape index: {}]   ;;  %s864_s4 = inlined_call_operand.vmem [shape: f32[1,128], index: 4, kind: input, shape index: {}]   ;;  %s865_s6 = inlined_call_operand.vmem [shape: f32[1,32], index: 6, kind: input, shape index: {}]   ;;  %s866_s8 = inlined_call_operand.vmem [shape: f32[1,2], index: 8, kind: input, shape index: {}]   ;;  %s867_s10 = inlined_call_operand.vmem [shape: f32[16,2], index: 10, kind: output, shape index: {0}]   ;;  %s868_s11 = inlined_call_operand.vmem [shape: f32[16,1], index: 11, kind: output, shape index: {1}]  }
   0x1   :  { %v39_v0 = vld [vmem:[%s857_s1] sm:$0xff]  ;;  %v40_v1 = vld [vmem:[%s857_s1 + $0x8] sm:$0xff]  ;;  %v134_v8 = vld [vmem:[%s859_s3 + $0x10] sm:$0xff] }
   0x2   :  { %v37_v2 = vld [vmem:[%s858_s0] sm:$0xff]  ;;  %v609_v3 = vpack.c.bf16 %v40_v1, %v39_v0  ;;  %v133_v5 = vld [vmem:[%s859_s3 + $0x8] sm:$0xff]  ;;  %v135_v9 = vld [vmem:[%s859_s3 + $0x18] sm:$0xff] }
   0x3   :  { %549 = vmatprep.mubr.msk.f32.mxu1 %vm48_vm0, %v37_v2  ;;  %v132_v4 = vld [vmem:[%s859_s3] sm:$0xff]  ;;  %v38_v7 = vld [vmem:[%s858_s0 + $0x8] sm:$0xff]  ;;  %v617_v10 = vpack.c.bf16 %v135_v9, %v134_v8  ;;  %v229_v13 = vld [vmem:[%s860_s5 + $0x10] sm:$0xff] }
   0x4   :  { %v613_v6 = vpack.c.bf16 %v133_v5, %v132_v4  ;;  %610 = vmatprep.subr.bf16.mxu1 %v609_v3  ;;  %v227_v11 = vld [vmem:[%s860_s5] sm:$0xff]  ;;  %v228_v12 = vld [vmem:[%s860_s5 + $0x8] sm:$0xff]  ;;  %v230_v15 = vld [vmem:[%s860_s5 + $0x18] sm:$0xff] }
   0x5   :  { %612 = vmatpush3.bf16.msra.mxu1 %v609_v3  ;;  %v621_v14 = vpack.c.bf16 %v228_v12, %v227_v11  ;;  %v625_v16 = vpack.c.bf16 %v230_v15, %v229_v13  ;;  %v231_v17 = vld [vmem:[%s860_s5 + $0x20] sm:$0xff]  ;;  %v232_v18 = vld [vmem:[%s860_s5 + $0x28] sm:$0xff]  ;;  %v233_v20 = vld [vmem:[%s860_s5 + $0x30] sm:$0xff] }
   0x6   :  { %614 = vmatprep.subr.bf16.mxu1 %v613_v6  ;;  %v629_v19 = vpack.c.bf16 %v232_v18, %v231_v17  ;;  %v234_v21 = vld [vmem:[%s860_s5 + $0x38] sm:$0xff]  ;;  %v235_v23 = vld [vmem:[%s860_s5 + $0x40] sm:$0xff]  ;;  %v236_v24 = vld [vmem:[%s860_s5 + $0x48] sm:$0xff] }
   0x7   :  { %622 = vmatprep.subr.bf16.mxu0 %v621_v14  ;;  %v633_v22 = vpack.c.bf16 %v234_v21, %v233_v20  ;;  %v637_v25 = vpack.c.bf16 %v236_v24, %v235_v23  ;;  %v237_v26 = vld [vmem:[%s860_s5 + $0x50] sm:$0xff]  ;;  %v238_v27 = vld [vmem:[%s860_s5 + $0x58] sm:$0xff]  ;;  %v239_v29 = vld [vmem:[%s860_s5 + $0x60] sm:$0xff] }
   0x8   :  { %550 = vmatmul.mubr.msk.f32.vlgmr.msra.gmra.mrb[0].mxu1 %vm48_vm0, %v38_v7  ;;  %624 = vmatpush3.bf16.msra.mxu0 %v621_v14  ;;  %v641_v28 = vpack.c.bf16 %v238_v27, %v237_v26  ;;  %v240_v30 = vld [vmem:[%s860_s5 + $0x68] sm:$0xff]  ;;  %v501_v32 = vld [vmem:[%s861_s2] ss:$0 sm:$0xff]  ;;  %v241_v39 = vld [vmem:[%s860_s5 + $0x70] sm:$0xff] }
   0x9   :  { %616 = vmatpush3.bf16.msra.mxu1 %v613_v6  ;;  %626 = vmatprep.subr.bf16.mxu0 %v625_v16  ;;  %v645_v31 = vpack.c.bf16 %v240_v30, %v239_v29  ;;  %v242_v40 = vld [vmem:[%s860_s5 + $0x78] sm:$0xff]  ;;  %v423_v42 = vld [vmem:[%s862_s9] sm:$0xff]  ;;  %v328_v45 = vld [vmem:[%s863_s7 + $0x8] sm:$0xff] }
   0xa   :  { %618 = vmatprep.subr.bf16.mxu1 %v617_v10  ;;  %v649_v41 = vpack.c.bf16 %v242_v40, %v241_v39  ;;  %v327_v43 = vld [vmem:[%s863_s7] sm:$0xff]  ;;  %v429_v44 = vmul.f32 0.38729835, %v423_v42  ;;  %v424_v54 = vld [vmem:[%s862_s9 + $0x8] sm:$0xff]  ;;  %v329_v56 = vld [vmem:[%s863_s7 + $0x10] sm:$0xff] }
   0xb   :  { %v653_v46 = vpack.c.bf16 %v328_v45, %v327_v43  ;;  %v504_v47 = vld [vmem:[%s864_s4] ss:$0 sm:$0xff]  ;;  %v430_v55 = vmul.f32 0.38729835, %v424_v54  ;;  %v330_v57 = vld [vmem:[%s863_s7 + $0x18] sm:$0xff]  ;;  %s668_s4 = smov 1  }
   0xc   :  { %628 = vmatpush3.bf16.msra.mxu0 %v625_v16  ;;  %433 = vrot.lane.b32.xlu0 %v429_v44, %s667_s28  ;;  %v657_v58 = vpack.c.bf16 %v330_v57, %v329_v56  ;;  %v427_v60 = vmul.f32 0.2236068, %v423_v42  ;;  %v428_v62 = vmul.f32 0.2236068, %v424_v54  ;;  %v507_v1 = vld [vmem:[%s865_s6] ss:$0 sm:$0xff] }
   0xd   :  { %620 = vmatpush3.bf16.msra.mxu1 %v617_v10  ;;  %630 = vmatprep.subr.bf16.mxu0 %v629_v19  ;;  %v508_v8 = vld [vmem:[%s866_s8] ss:$0 sm:$0xff]  ;;  %v426_v14 = vmul.f32 0.4472136, %v424_v54  ;;  %v425_v16 = vmul.f32 0.4472136, %v423_v42 }
   0xe   :  { %654 = vmatprep.subr.bf16.mxu1 %v653_v46 }
  0x10   :  { %632 = vmatpush3.bf16.msra.mxu0 %v629_v19  ;;  %435 = vrot.lane.b32.xlu0 %v430_v55, %s667_s28 }
  0x11   :  { %634 = vmatprep.subr.bf16.mxu0 %v633_v22 }
  0x14   :  { %636 = vmatpush3.bf16.msra.mxu0 %v633_v22 }
  0x15   :  { %638 = vmatprep.subr.bf16.mxu0 %v637_v25 }
  0x18   :  { %640 = vmatpush3.bf16.msra.mxu0 %v637_v25 }
  0x19   :  { %642 = vmatprep.subr.bf16.mxu0 %v641_v28 }
  0x1c   :  { %644 = vmatpush3.bf16.msra.mxu0 %v641_v28 }
  0x1d   :  { %646 = vmatprep.subr.bf16.mxu0 %v645_v31 }
  0x20   :  { %648 = vmatpush3.bf16.msra.mxu0 %v645_v31 }
  0x21   :  { %650 = vmatprep.subr.bf16.mxu0 %v649_v41 }
  0x24   :  { %652 = vmatpush3.bf16.msra.mxu0 %v649_v41 }
  0x7e   :  { %v434_v59 = vpop.permute.xlu0 %433 }
  0x7f   :  { %v439_v61 = vadd.f32 %v434_v59, %v427_v60 }
  0x81   :  { %443 = vrot.lane.b32.xlu1 %v439_v61, %s668_s4 }
  0x82   :  { %v436_v63 = vpop.permute.xlu0 %435 }
  0x83   :  { %v440_v0 = vadd.f32 %v436_v63, %v428_v62 }
  0x85   :  { %445 = vrot.lane.b32.xlu1 %v440_v0, %s668_s4 }
  0xdb   :  { %v551_v33 = vpop.f32.mrb[0].mxu1 }
  0xdc   :  { %v127_v34 = vadd.f32 %v551_v33, %v501_v32  ;;  %v121_v35 = vpop.f32.mrb[1].mxu1 }
  0xdd   :  { %v122_v36 = vadd.f32 %v501_v32, %v121_v35 }
  0xde   :  { %v131_v38 = vmax.f32 %v127_v34, 0.0 }
  0xdf   :  { %v130_v37 = vmax.f32 %v122_v36, 0.0 }
  0xe1   :  { %560 = vmatprep.mubr.msk.f32.mxu1 %vm143_vm1, %v130_v37 }
  0xe2   :  { %561 = vmatmul.mubr.msk.f32.vlgmr.msra.gmra.mrb[2].mxu1 %vm143_vm1, %v131_v38 }
  0xe3   :  { %656 = vmatpush3.bf16.msra.mxu1 %v653_v46 }
  0xe4   :  { %658 = vmatprep.subr.bf16.mxu1 %v657_v58 }
  0xe7   :  { %660 = vmatpush3.bf16.msra.mxu1 %v657_v58 }
  0xf3   :  { %v444_v13 = vpop.permute.xlu1 %443 }
  0xf4   :  { %v450_v22 = vsel %vm449_vm2, %v425_v16, %v444_v13 }
  0xf7   :  { %v446_v15 = vpop.permute.xlu1 %445 }
  0xf8   :  { %v451_v18 = vsel %vm449_vm2, %v426_v14, %v446_v15 }
 0x1b5   :  { %v562_v48 = vpop.f32.mrb[2].mxu1 }
 0x1b6   :  { %v222_v49 = vadd.f32 %v562_v48, %v504_v47  ;;  %v216_v50 = vpop.f32.mrb[3].mxu1 }
 0x1b7   :  { %v217_v51 = vadd.f32 %v504_v47, %v216_v50 }
 0x1b8   :  { %v226_v53 = vmax.f32 %v222_v49, 0.0 }
 0x1b9   :  { %v225_v52 = vmax.f32 %v217_v51, 0.0 }
 0x1bb   :  { %595 = vmatprep.mubr.f32.mxu0 %v225_v52 }
 0x1bc   :  { %596 = vmatmul.mubr.f32.vlgmr.msra.gmra.mrb[0].mxu0 %v226_v53 }
 0x28f   :  { %v597_v2 = vpop.f32.mrb[0].mxu0 }
 0x290   :  { %v322_v3 = vadd.f32 %v597_v2, %v507_v1  ;;  %v316_v4 = vpop.f32.mrb[1].mxu0 }
 0x291   :  { %v317_v5 = vadd.f32 %v507_v1, %v316_v4 }
 0x292   :  { %v326_v7 = vmax.f32 %v322_v3, 0.0 }
 0x293   :  { %v325_v6 = vmax.f32 %v317_v5, 0.0 }
 0x295   :  { %606 = vmatprep.mubr.msk.f32.mxu1 %vm143_vm1, %v325_v6 }
 0x296   :  { %607 = vmatmul.mubr.msk.f32.vlgmr.msra.gmra.mrb[4].mxu1 %vm143_vm1, %v326_v7 }
 0x369   :  { %v608_v9 = vpop.f32.mrb[4].mxu1 }
 0x36a   :  { %v416_v10 = vadd.f32 %v608_v9, %v508_v8  ;;  %v410_v11 = vpop.f32.mrb[5].mxu1 }
 0x36b   :  { %v411_v12 = vadd.f32 %v508_v8, %v410_v11 }
 0x36c   :  { %663 = vtanh.f32 %v416_v10 }
 0x36d   :  { %665 = vtanh.f32 %v411_v12 }
 0x376   :  { %v664_v17 = vpop.eup %663 }
 0x377   :  { %v666_v19 = vpop.eup %665  ;;  %v422_v20 = vmul.f32 0.5, %v664_v17 }
 0x378   :  { %v421_v21 = vmul.f32 0.5, %v666_v19 }
 0x379   :  { %v453_v23 = vadd.f32 %v451_v18, %v422_v20 }
 0x37a   :  { %v452_v24 = vadd.f32 %v450_v22, %v421_v21 }
 0x37b   :  { %456 = vst.msk [vmem:[%s867_s10 + $0x8] sm:$0xff] %vm454_vm3, %v453_v23  ;;  %v458_v25 = vsub.f32 %v453_v23, %v422_v20 }
 0x37c   :  { %455 = vst.msk [vmem:[%s867_s10] sm:$0xff] %vm454_vm3, %v452_v24  ;;  %v457_v26 = vsub.f32 %v452_v24, %v421_v21 }
 0x37d   :  { %467 = vrot.lane.b32.xlu1 %v458_v25, %s667_s28  ;;  %v460_v27 = vmul.f32 %v458_v25, %v458_v25 }
 0x37e   :  { %465 = vrot.lane.b32.xlu0 %v457_v26, %s667_s28  ;;  %v459_v28 = vmul.f32 %v457_v26, %v457_v26 }
 0x37f   :  { %v462_v29 = vmul.f32 6.6666665, %v460_v27 }
 0x380   :  { %v461_v30 = vmul.f32 6.6666665, %v459_v28 }
 0x381   :  { %481 = vrot.lane.b32.xlu1 %v462_v29, %s667_s28 }
 0x382   :  { %479 = vrot.lane.b32.xlu0 %v461_v30, %s667_s28 }
 0x3ef   :  { %v468_v31 = vpop.permute.xlu1 %467 }
 0x3f0   :  { %v472_v32 = vmul.f32 %v468_v31, %v458_v25  ;;  %v466_v33 = vpop.permute.xlu0 %465 }
 0x3f1   :  { %v471_v34 = vmul.f32 %v466_v33, %v457_v26 }
 0x3f2   :  { %v474_v35 = vmul.f32 -6.6666665, %v472_v32 }
 0x3f3   :  { %v473_v36 = vmul.f32 -6.6666665, %v471_v34  ;;  %v482_v38 = vpop.permute.xlu1 %481 }
 0x3f4   :  { %v476_v37 = vadd.f32 %v474_v35, %v462_v29  ;;  %v480_v41 = vpop.permute.xlu0 %479 }
 0x3f5   :  { %v475_v39 = vadd.f32 %v473_v36, %v461_v30 }
 0x3f6   :  { %v486_v40 = vadd.f32 %v482_v38, %v476_v37 }
 0x3f7   :  { %v485_v42 = vadd.f32 %v480_v41, %v475_v39 }
 0x3f8   :  { %v488_v43 = vmul.f32 0.5, %v486_v40 }
 0x3f9   :  { %v487_v44 = vmul.f32 0.5, %v485_v42 }
 0x3fa   :  { %v490_v45 = vsub.f32 -0.08459812, %v488_v43 }
 0x3fb   :  { %v489_v46 = vsub.f32 -0.08459812, %v487_v44 }
 0x3fc   :  { %492 = vst.msk [vmem:[%s868_s11 + $0x8] sm:$0xff] %vm449_vm2, %v490_v45 }
 0x3fd   :  { %491 = vst.msk [vmem:[%s868_s11] sm:$0xff] %vm449_vm2, %v489_v46 }

</bundles_post_ra>
